<compile_context>
chip_gen: v7x
topology: tpu7x:2x2x1
jax: 0.10.0
libtpu: 0.0.40
codegen_flags: <defaults>
</compile_context>

<pallas_src>
import jax
import jax.numpy as jnp
from jax.experimental import pallas as pl
from jax.experimental.pallas import tpu as pltpu


def _round_up(n, m):
    return ((n + m - 1) // m) * m


def _logreg_kernel(x_ref, w_ref, b_ref, o_ref):
    # x_ref: [TB, F] native dtype (streamed), w_ref: [1, F] f32 (resident),
    # b_ref: [1] f32 in SMEM, o_ref: [TB, 1] f32.
    x = x_ref[...]
    w = w_ref[...]
    # Broadcast-multiply on the VPU (x promoted to f32 per-vreg) + lane
    # reduction on the XLU.  Both units are idle in this mem-bound kernel.
    z = jnp.sum(x * w, axis=-1, keepdims=True)   # [TB, 1] f32
    z = z + b_ref[0]                             # scalar bias from SMEM
    # sigmoid(z) = 1 / (1 + exp(-z)); exp goes to the EUP slot.
    o_ref[...] = (1.0 / (1.0 + jnp.exp(-z))).astype(o_ref.dtype)


def model_forward(x, weight, bias, *, block_b=None):
    """Pallas equivalent of torch.sigmoid(nn.Linear(F, 1)(x)).

    x: [B, F], weight: [1, F] (PyTorch layout), bias: [1]  ->  [B, 1] float32.
    """
    B, F = x.shape
    w = weight.reshape(1, F).astype(jnp.float32)   # lane-dense, VMEM-resident
    b = bias.reshape(1).astype(jnp.float32)        # SMEM scalar

    itemsize = jnp.dtype(x.dtype).itemsize
    f_pad = _round_up(F, 128)                      # lane padding in VMEM
    sublane = 8 * max(1, 4 // itemsize)            # f32:8, bf16:16, int8/fp8:32

    # --- per-generation VMEM budget (v5e/v6e: 128 MiB, v7x: 64 MiB per TC) ---
    try:
        phys_vmem = int(getattr(pltpu.get_tpu_info(), "vmem_capacity_bytes",
                                64 * 1024 * 1024))
    except Exception:
        phys_vmem = 64 * 1024 * 1024               # conservative (v7x per-TC)
    vmem_limit = min(phys_vmem * 3 // 4, 96 * 1024 * 1024)  # ~48 MiB v7x, 96 MiB v5e/v6e

    if block_b is None:
        # Per-row VMEM cost of one grid step, counting lane padding:
        #   x tile (double-buffered, native dtype) + out block (double-buffered,
        #   f32, (block_b, 1) pads to 128 lanes).
        bytes_per_row = 2 * f_pad * itemsize + 2 * 128 * 4
        resident = 2 * 8 * f_pad * 4               # weight buffers ([1,F] -> [8,f_pad])
        budget = vmem_limit - resident - 2 * 1024 * 1024   # compiler-scratch headroom
        max_rows = max(0, budget) // bytes_per_row
        if B <= max_rows:
            block_b = B                             # single full-extent block
        else:
            block_b = (max_rows // sublane) * sublane
            if block_b < sublane:
                # TODO(synk): for extremely wide F (a minimum row tile alone
                # exceeds the VMEM budget) add an F grid axis with an f32
                # accumulator (init/finalize via pl.when) instead of clamping.
                block_b = sublane
    block_b = int(block_b)

    num_tiles = pl.cdiv(B, block_b)   # last block may be partial (masked store)

    out = pl.pallas_call(
        _logreg_kernel,
        out_shape=jax.ShapeDtypeStruct((B, 1), jnp.float32),
        grid_spec=pltpu.PrefetchScalarGridSpec(
            num_scalar_prefetch=0,
            grid=(num_tiles,),
            in_specs=[
                pl.BlockSpec((block_b, F), lambda i: (i, 0)),        # x tile (streamed)
                pl.BlockSpec((1, F), lambda i: (0, 0)),              # weight (resident)
                pl.BlockSpec(memory_space=pltpu.MemorySpace.SMEM),   # bias scalar
            ],
            out_specs=pl.BlockSpec((block_b, 1), lambda i: (i, 0)),
        ),
        compiler_params=pltpu.CompilerParams(
            dimension_semantics=("parallel",),   # rows independent -> megacore split
            vmem_limit_bytes=int(vmem_limit),
        ),
        cost_estimate=pl.CostEstimate(
            flops=2 * B * F,
            transcendentals=B,
            bytes_accessed=B * F * itemsize + F * 4 + 4 + B * 4,
        ),
    )(x, w, b)

    return out


if __name__ == "__main__":
    key = jax.random.PRNGKey(0)
    kx, kw, kb = jax.random.split(key, 3)

    B, F = 8, 32  # batch=8, n_input_features=32
    x = jax.random.normal(kx, (B, F), dtype=jnp.float32)

    # Deterministic nn.Linear-style init: U(-1/sqrt(F), 1/sqrt(F))
    bound = 1.0 / jnp.sqrt(jnp.float32(F))
    weight = jax.random.uniform(kw, (1, F), minval=-bound, maxval=bound,
                                dtype=jnp.float32)  # PyTorch layout [out=1, in=F]
    bias = jax.random.uniform(kb, (1,), minval=-bound, maxval=bound,
                              dtype=jnp.float32)

    y = model_forward(x, weight, bias)
    jax.block_until_ready(y)
    y_ref = jax.nn.sigmoid(x @ weight.T + bias)
    assert y.shape == (B, 1)
    assert jnp.allclose(y, y_ref, atol=1e-5, rtol=1e-5)

    # Batch not sublane-aligned: single full-extent block, no padding copy.
    B2 = 12
    x2 = jax.random.normal(kx, (B2, F), dtype=jnp.float32)
    y2 = model_forward(x2, weight, bias)
    jax.block_until_ready(y2)
    y2_ref = jax.nn.sigmoid(x2 @ weight.T + bias)
    assert y2.shape == (B2, 1)
    assert jnp.allclose(y2, y2_ref, atol=1e-5, rtol=1e-5)

    # Multi-tile grid with a masked partial last block (forced small tile).
    B3 = 20
    x3 = jax.random.normal(kb, (B3, F), dtype=jnp.float32)
    y3 = model_forward(x3, weight, bias, block_b=8)
    jax.block_until_ready(y3)
    y3_ref = jax.nn.sigmoid(x3 @ weight.T + bias)
    assert y3.shape == (B3, 1)
    assert jnp.allclose(y3, y3_ref, atol=1e-5, rtol=1e-5)

    print("KERNEL_OK")
</pallas_src>

<mosaic_0001>
module attributes {stable_mosaic.version = 11 : i64} {
  func.func @_logreg_kernel(%arg0: i32, %arg1: memref<8x32xf32, #tpu.memory_space<vmem>>, %arg2: memref<1x32xf32, #tpu.memory_space<vmem>>, %arg3: memref<1xf32, #tpu.memory_space<smem>>, %arg4: memref<8x1xf32, #tpu.memory_space<vmem>>) attributes {dimension_semantics = [#tpu.dimension_semantics<parallel>], iteration_bounds = array<i64: 1>, scalar_prefetch = 0 : i64, scratch_operands = 0 : i64, tpu.core_type = #tpu.core_type<tc>, window_params = [{transform_indices = @transform_0, window_bounds = array<i64: 8, 32>}, {pipeline_mode = #tpu.pipeline_mode<synchronous>, transform_indices = @transform_1, window_bounds = array<i64: 1, 32>}, {transform_indices = @transform_2, window_bounds = array<i64: 1>}, {transform_indices = @transform_3, window_bounds = array<i64: 8, 1>}]} {
    %c0 = arith.constant 0 : index
    %c0_0 = arith.constant 0 : index
    %0 = vector.load %arg1[%c0, %c0_0] : memref<8x32xf32, #tpu.memory_space<vmem>>, vector<8x32xf32>
    %c0_1 = arith.constant 0 : index
    %c0_2 = arith.constant 0 : index
    %1 = vector.load %arg2[%c0_1, %c0_2] : memref<1x32xf32, #tpu.memory_space<vmem>>, vector<1x32xf32>
    %2 = vector.broadcast %1 : vector<1x32xf32> to vector<8x32xf32>
    %3 = arith.mulf %0, %2 : vector<8x32xf32>
    %cst = arith.constant dense<0.000000e+00> : vector<8xf32>
    %4 = vector.multi_reduction <add>, %3, %cst [1] : vector<8x32xf32> to vector<8xf32>
    %5 = vector.shape_cast %4 : vector<8xf32> to vector<8x1xf32>
    %c0_3 = arith.constant 0 : index
    %6 = memref.load %arg3[%c0_3] : memref<1xf32, #tpu.memory_space<smem>>
    %7 = vector.broadcast %6 : f32 to vector<8x1xf32>
    %8 = arith.addf %5, %7 : vector<8x1xf32>
    %cst_4 = arith.constant 0.000000e+00 : f32
    %9 = vector.broadcast %cst_4 : f32 to vector<8x1xf32>
    %10 = arith.subf %9, %8 : vector<8x1xf32>
    %11 = math.exp %10 : vector<8x1xf32>
    %cst_5 = arith.constant 1.000000e+00 : f32
    %12 = vector.broadcast %cst_5 : f32 to vector<8x1xf32>
    %13 = arith.addf %12, %11 : vector<8x1xf32>
    %cst_6 = arith.constant 1.000000e+00 : f32
    %14 = vector.broadcast %cst_6 : f32 to vector<8x1xf32>
    %15 = arith.divf %14, %13 : vector<8x1xf32>
    %c0_7 = arith.constant 0 : index
    %c0_8 = arith.constant 0 : index
    %16 = vector.load %arg4[%c0_7, %c0_8] : memref<8x1xf32, #tpu.memory_space<vmem>>, vector<8x1xf32>
    tpu.vector_store %arg4[%c0_7, %c0_8], %15 {strides = array<i32>} : memref<8x1xf32, #tpu.memory_space<vmem>>, vector<8x1xf32>,
    return
  }
  func.func @transform_0(%arg0: i32) -> (i32, i32) {
    %c0_i32 = arith.constant 0 : i32
    %c0_i32_0 = arith.constant 0 : i32
    return %arg0, %c0_i32 : i32, i32
  }
  func.func @transform_1(%arg0: i32) -> (i32, i32) {
    %c0_i32 = arith.constant 0 : i32
    %c0_i32_0 = arith.constant 0 : i32
    %c0_i32_1 = arith.constant 0 : i32
    return %c0_i32, %c0_i32_0 : i32, i32
  }
  func.func @transform_2(%arg0: i32) -> i32 {
    %c0_i32 = arith.constant 0 : i32
    %c0_i32_0 = arith.constant 0 : i32
    return %c0_i32 : i32
  }
  func.func @transform_3(%arg0: i32) -> (i32, i32) {
    %c0_i32 = arith.constant 0 : i32
    %c0_i32_0 = arith.constant 0 : i32
    return %arg0, %c0_i32 : i32, i32
  }
}

</mosaic_0001>

<bundles_post_ra>
// kernel: tpu_custom_call.1
= control target key start
LH: loop header
LB: loop body
LE: loop exit
PB: predicated region body
PF: predicated region fallthrough
CT: control target
= control target key end

     0   :  { %9 = vsyncpa [#allocation4], 0  ;;  %s86_s12 = smov [#allocation3]   ;;  %s128_s0 = inlined_call_operand.hbm [shape: f32[8,32], index: 0, kind: input, shape index: {}]   ;;  %s129_s1 = inlined_call_operand.vmem [shape: f32[1,32], index: 1, kind: input, shape index: {}]   ;;  %s130_s2 = inlined_call_operand.<no memory space> [shape: f32[1], index: 2, kind: input, shape index: {}]   ;;  %s131_s3 = inlined_call_operand.vmem [shape: f32[8,1], index: 3, kind: output, shape index: {}]  }
   0x1   :  { %s16_s13 = sshll.u32 %s86_s12, 4  ;;  %s62_s16 = scalar_lea.hbm %s128_s0, 128  ;;  %s17_s13 = int_to_ptr.vmem [resolvable:$true] %s16_s13 }
   0x2   :  { %p63_p0 = scmp.ne.s32.totalorder %s128_s0, %s62_s16  ;;  %p66_p1 = scmp.lt.u32.totalorder %s62_s16, %s128_s0 }
   0x4   :  { %p68_p2 = pnand %p66_p1, %p63_p0 }
   0x6   :  { %71 = shalt.err (!%p68_p2)
}
   0x7   :  { %s72_s21 = scalar_lea.vmem %s17_s13, 128  ;;  %p77_p4 = scmp.lt.s32.totalorder %s17_s13, %s17_s13 }
   0x8   :  { %p73_p3 = scmp.ne.s32.totalorder %s17_s13, %s72_s21  ;;  %p78_p5 = scmp.lt.s32.totalorder %s72_s21, %s72_s21 }
   0xa   :  { %p79_p6 = por %p78_p5, %p77_p4 }
   0xc   :  { %p80_p7 = pnand %p79_p6, %p73_p3 }
   0xe   :  { %83 = shalt.err (!%p80_p7)
}
   0xf   :  { %19 = dma.hbm_to_vmem [thread:$0]  %s128_s0, 128, %s17_s13, [#allocation4]  }
  0x10   :  { %84 = dma.done.wait [#allocation4], 128  }
  0x11   :  { %85 = vsyncadd [#allocation4], 4294967168  ;;  %v27_v0 = vld [vmem:[#allocation3] sm:$0xff]  ;;  %vm36_vm0 = vcmask 261120   ;;  %v41_v4 = vstv %s130_s2  ;;  %vm49_vm1 = vcmask 7168  }
  0x12   :  { %v56_v1 = vld [vmem:[%s129_s1] ss:$0 sm:$0xff] }
  0x13   :  { %v35_v2 = vmul.f32 %v56_v1, %v27_v0 }
  0x15   :  { %v37_v3 = vsel %vm36_vm0, %v35_v2, 0.0 }
  0x16   :  { %38 = vadd.xlane.f32.xlu0 %v37_v3 }
  0xa3   :  { %v39_v5 = vpop.xlane.xlu0 %38 }
  0xa4   :  { %v42_v6 = vadd.f32 %v41_v4, %v39_v5 }
  0xa6   :  { %v43_v7 = vsub.f32 0.0, %v42_v6 }
  0xa8   :  { %v44_v8 = vmul.f32 1.442695, %v43_v7 }
  0xaa   :  { %58 = vpow2.f32 %v44_v8 }
  0xb4   :  { %v59_v9 = vpop.eup %58 }
  0xb5   :  { %v46_v10 = vadd.f32 1.0, %v59_v9 }
  0xb7   :  { %60 = vrcp.f32 %v46_v10 }
  0xc1   :  { %v61_v11 = vpop.eup %60 }
  0xc2   :  { %50 = vst.msk [vmem:[%s131_s3] sm:$0xff] %vm49_vm1, %v61_v11 }
  0xc3   :  { %55 = vsyncpa [#allocation4], 1 }

</bundles_post_ra>
